<compile_context>
chip_gen: v6e
topology: v6e:2x2x1
jax: 0.10.0
libtpu: 0.0.40
codegen_flags: <defaults>
</compile_context>

<pallas_src>
import functools

import jax
import jax.numpy as jnp
from jax.experimental import pallas as pl
from jax.experimental.pallas import tpu as pltpu

# ----------------------------- problem sizes --------------------------------
B       = 2     # batch
N_NODES = 4     # N  (graph nodes)
T_SEQ   = 8     # T  (sequence length)
D_MODEL = 32    # d_model  (== `size` given to nn.LayerNorm)
LN_EPS  = 1e-5  # torch.nn.LayerNorm default eps

DEFAULT_TILE_R = 512   # rows per grid step; sized for v7x's 32 MiB scoped VMEM
PARAM_ROWS     = 8     # packed param tile sublane count (bias/gamma/beta + pad)


def _round_up(n, m):
    return ((n + m - 1) // m) * m


# ------------------------------ Pallas kernel --------------------------------
def sublayer_connection_kernel(x_ref, w_ref, p_ref, o_ref, *,
                               residual_connection: bool, use_layer_norm: bool):
    """Fused SublayerConnection for one row tile.

    Refs (per grid step):
      x_ref : (TILE_R, D)  input rows
      w_ref : (D, D)       sublayer (stand-in) weight      [resident]
      p_ref : (8, D)       packed [bias; gamma; beta; 0..] [resident]
      o_ref : (TILE_R, D)  output rows
    """
    x = x_ref[...].astype(jnp.float32)          # (TILE_R, D)
    w = w_ref[...].astype(jnp.float32)          # (D, D)
    p = p_ref[...].astype(jnp.float32)          # (8, D)
    b = p[0:1, :]                               # sublayer bias (1, D)

    # --- norm(x) -------------------------------------------------------------
    if use_layer_norm:
        g    = p[1:2, :]
        beta = p[2:3, :]
        mean = jnp.mean(x, axis=-1, keepdims=True)                 # (TILE_R, 1)
        ctr  = x - mean
        var  = jnp.mean(ctr * ctr, axis=-1, keepdims=True)         # biased var
        h    = ctr * jax.lax.rsqrt(var + LN_EPS) * g + beta        # (TILE_R, D)
    else:
        h = x

    # --- sublayer(h): Linear + ReLU stand-in (one MXU matmul per tile) -------
    s = jnp.dot(h, w, preferred_element_type=jnp.float32) + b      # (TILE_R, D)
    s = jnp.maximum(s, 0.0)

    # --- dropout (identity at inference) + residual --------------------------
    y = x + s if residual_connection else s
    o_ref[...] = y.astype(o_ref.dtype)


# ------------------------------ host wrapper ---------------------------------
def sublayer_connection_forward(x, w_sub, b_sub, gamma, beta, *,
                                residual_connection=True, use_layer_norm=True,
                                tile_r=DEFAULT_TILE_R):
    """x: (B, N, T, D) -> (B, N, T, D). Row-tiled, pipelined Pallas call."""
    assert residual_connection or use_layer_norm, \
        "torch module returns None when both flags are False"
    Bb, Nn, Tt, D = x.shape
    R = Bb * Nn * Tt
    x_flat = x.reshape(R, D)

    # Tile size: multiple of 8 sublanes; no padding for small R, bounded for
    # large R (keeps double-buffered in+out footprint tiny even on v7x VMEM).
    TILE_R = min(tile_r, _round_up(R, 8))
    R_pad = _round_up(R, TILE_R)
    if R_pad != R:
        # Zero-pad rows; LN of a zero row is finite (rsqrt(eps)), results are
        # sliced off afterwards.
        x_flat = jnp.pad(x_flat, ((0, R_pad - R), (0, 0)))

    # Pack [sublayer_bias, ln_gamma, ln_beta] into one (8, D) resident tile.
    params = jnp.zeros((PARAM_ROWS, D), jnp.float32)
    params = params.at[0].set(b_sub.reshape(D).astype(jnp.float32))
    params = params.at[1].set(gamma.reshape(D).astype(jnp.float32))
    params = params.at[2].set(beta.reshape(D).astype(jnp.float32))

    kernel = functools.partial(
        sublayer_connection_kernel,
        residual_connection=residual_connection,
        use_layer_norm=use_layer_norm,
    )

    itemsize = jnp.dtype(x.dtype).itemsize
    cost = pl.CostEstimate(
        flops=2 * R_pad * D * D + 8 * R_pad * D,
        transcendentals=R_pad if use_layer_norm else 0,
        bytes_accessed=2 * R_pad * D * itemsize + (D * D + PARAM_ROWS * D) * 4,
    )

    out_flat = pl.pallas_call(
        kernel,
        out_shape=jax.ShapeDtypeStruct((R_pad, D), x.dtype),
        grid=(R_pad // TILE_R,),
        in_specs=[
            pl.BlockSpec((TILE_R, D), lambda i: (i, 0)),        # x rows (tiled)
            pl.BlockSpec((D, D), lambda i: (0, 0)),             # weight (resident)
            pl.BlockSpec((PARAM_ROWS, D), lambda i: (0, 0)),    # packed params
        ],
        out_specs=pl.BlockSpec((TILE_R, D), lambda i: (i, 0)),
        compiler_params=pltpu.CompilerParams(
            dimension_semantics=("parallel",)),                 # megacore on v7x
        cost_estimate=cost,
    )(x_flat, w_sub, params)

    if R_pad != R:
        out_flat = out_flat[:R]
    return out_flat.reshape(Bb, Nn, Tt, D)


# -------------------------- pure-JAX reference -------------------------------
def sublayer_connection_reference(x, w_sub, b_sub, gamma, beta, *,
                                  residual_connection=True, use_layer_norm=True):
    xf = x.astype(jnp.float32)
    wf = w_sub.astype(jnp.float32)
    bf = b_sub.astype(jnp.float32)
    if use_layer_norm:
        mean = jnp.mean(xf, axis=-1, keepdims=True)
        var = jnp.mean((xf - mean) ** 2, axis=-1, keepdims=True)
        h = (xf - mean) * jax.lax.rsqrt(var + LN_EPS) * gamma + beta
    else:
        h = xf
    s = jnp.maximum(h @ wf + bf, 0.0)             # sublayer stand-in
    return xf + s if residual_connection else s   # dropout == identity (eval)


# ----------------------------------- main ------------------------------------
if __name__ == "__main__":
    key = jax.random.PRNGKey(0)
    kx, kw, kb = jax.random.split(key, 3)

    x = jax.random.normal(kx, (B, N_NODES, T_SEQ, D_MODEL), jnp.float32)

    scale = 1.0 / jnp.sqrt(jnp.float32(D_MODEL))
    w_sub = jax.random.normal(kw, (D_MODEL, D_MODEL), jnp.float32) * scale
    b_sub = jax.random.normal(kb, (1, D_MODEL), jnp.float32) * 0.01
    gamma = jnp.ones((1, D_MODEL), jnp.float32)    # nn.LayerNorm weight init
    beta  = jnp.zeros((1, D_MODEL), jnp.float32)   # nn.LayerNorm bias init

    # Exercise all three defined branches of SublayerConnection.forward (f32).
    for res, ln in ((True, True), (True, False), (False, True)):
        out = sublayer_connection_forward(
            x, w_sub, b_sub, gamma, beta,
            residual_connection=res, use_layer_norm=ln)
        out = jax.block_until_ready(out)
        ref = sublayer_connection_reference(
            x, w_sub, b_sub, gamma, beta,
            residual_connection=res, use_layer_norm=ln)
        assert out.shape == (B, N_NODES, T_SEQ, D_MODEL)
        assert jnp.allclose(out, ref, atol=1e-4, rtol=1e-4), \
            f"mismatch vs JAX reference (residual={res}, layer_norm={ln})"

    # bf16 I/O sanity check (HBM traffic halves; math stays f32 in-kernel).
    x_bf16 = x.astype(jnp.bfloat16)
    w_bf16 = w_sub.astype(jnp.bfloat16)
    out_bf = sublayer_connection_forward(
        x_bf16, w_bf16, b_sub, gamma, beta,
        residual_connection=True, use_layer_norm=True)
    out_bf = jax.block_until_ready(out_bf)
    ref_bf = sublayer_connection_reference(
        x_bf16, w_bf16, b_sub, gamma, beta,
        residual_connection=True, use_layer_norm=True)
    assert out_bf.dtype == jnp.bfloat16
    assert jnp.allclose(out_bf.astype(jnp.float32), ref_bf, atol=5e-2, rtol=5e-2), \
        "mismatch vs JAX reference (bf16 I/O)"

    print("KERNEL_OK")
</pallas_src>

<mosaic_0001>
module attributes {stable_mosaic.version = 11 : i64} {
  func.func @sublayer_connection_kernel(%arg0: i32, %arg1: memref<64x32xf32, #tpu.memory_space<vmem>>, %arg2: memref<32x32xf32, #tpu.memory_space<vmem>>, %arg3: memref<8x32xf32, #tpu.memory_space<vmem>>, %arg4: memref<64x32xf32, #tpu.memory_space<vmem>>) attributes {dimension_semantics = [#tpu.dimension_semantics<parallel>], iteration_bounds = array<i64: 1>, scalar_prefetch = 0 : i64, scratch_operands = 0 : i64, tpu.core_type = #tpu.core_type<tc>, window_params = [{transform_indices = @transform_0, window_bounds = array<i64: 64, 32>}, {pipeline_mode = #tpu.pipeline_mode<synchronous>, transform_indices = @transform_1, window_bounds = array<i64: 32, 32>}, {pipeline_mode = #tpu.pipeline_mode<synchronous>, transform_indices = @transform_2, window_bounds = array<i64: 8, 32>}, {transform_indices = @transform_3, window_bounds = array<i64: 64, 32>}]} {
    %c0 = arith.constant 0 : index
    %c0_0 = arith.constant 0 : index
    %0 = vector.load %arg1[%c0, %c0_0] : memref<64x32xf32, #tpu.memory_space<vmem>>, vector<64x32xf32>
    %c0_1 = arith.constant 0 : index
    %c0_2 = arith.constant 0 : index
    %1 = vector.load %arg2[%c0_1, %c0_2] : memref<32x32xf32, #tpu.memory_space<vmem>>, vector<32x32xf32>
    %c0_3 = arith.constant 0 : index
    %c0_4 = arith.constant 0 : index
    %2 = vector.load %arg3[%c0_3, %c0_4] : memref<8x32xf32, #tpu.memory_space<vmem>>, vector<8x32xf32>
    %3 = vector.extract_strided_slice %2 {offsets = [0, 0], sizes = [1, 32], strides = [1, 1]} : vector<8x32xf32> to vector<1x32xf32>
    %4 = vector.extract_strided_slice %2 {offsets = [1, 0], sizes = [1, 32], strides = [1, 1]} : vector<8x32xf32> to vector<1x32xf32>
    %5 = vector.extract_strided_slice %2 {offsets = [2, 0], sizes = [1, 32], strides = [1, 1]} : vector<8x32xf32> to vector<1x32xf32>
    %cst = arith.constant dense<0.000000e+00> : vector<64xf32>
    %6 = vector.multi_reduction <add>, %0, %cst [1] : vector<64x32xf32> to vector<64xf32>
    %7 = vector.shape_cast %6 : vector<64xf32> to vector<64x1xf32>
    %cst_5 = arith.constant 3.200000e+01 : f32
    %8 = vector.broadcast %cst_5 : f32 to vector<64x1xf32>
    %9 = arith.divf %7, %8 : vector<64x1xf32>
    %10 = vector.broadcast %9 : vector<64x1xf32> to vector<64x32xf32>
    %11 = arith.subf %0, %10 : vector<64x32xf32>
    %12 = arith.mulf %11, %11 : vector<64x32xf32>
    %cst_6 = arith.constant dense<0.000000e+00> : vector<64xf32>
    %13 = vector.multi_reduction <add>, %12, %cst_6 [1] : vector<64x32xf32> to vector<64xf32>
    %14 = vector.shape_cast %13 : vector<64xf32> to vector<64x1xf32>
    %cst_7 = arith.constant 3.200000e+01 : f32
    %15 = vector.broadcast %cst_7 : f32 to vector<64x1xf32>
    %16 = arith.divf %14, %15 : vector<64x1xf32>
    %cst_8 = arith.constant 9.99999974E-6 : f32
    %17 = vector.broadcast %cst_8 : f32 to vector<64x1xf32>
    %18 = arith.addf %16, %17 : vector<64x1xf32>
    %19 = math.rsqrt %18 : vector<64x1xf32>
    %20 = vector.broadcast %19 : vector<64x1xf32> to vector<64x32xf32>
    %21 = arith.mulf %11, %20 : vector<64x32xf32>
    %22 = vector.broadcast %4 : vector<1x32xf32> to vector<64x32xf32>
    %23 = arith.mulf %21, %22 : vector<64x32xf32>
    %24 = vector.broadcast %5 : vector<1x32xf32> to vector<64x32xf32>
    %25 = arith.addf %23, %24 : vector<64x32xf32>
    %cst_9 = arith.constant dense<0.000000e+00> : vector<64x32xf32>
    %26 = tpu.matmul %25, %1, %cst_9 {dimension_numbers = #tpu.dot_dimension_numbers<[1], [0], [0], [1], [0, 0, 1, 1], [], []>} : vector<64x32xf32>, vector<32x32xf32>, vector<64x32xf32> -> vector<64x32xf32>
    %27 = vector.broadcast %3 : vector<1x32xf32> to vector<64x32xf32>
    %28 = arith.addf %26, %27 : vector<64x32xf32>
    %cst_10 = arith.constant 0.000000e+00 : f32
    %29 = vector.broadcast %cst_10 : f32 to vector<64x32xf32>
    %30 = arith.maximumf %28, %29 : vector<64x32xf32>
    %31 = arith.addf %0, %30 : vector<64x32xf32>
    %c0_11 = arith.constant 0 : index
    %c0_12 = arith.constant 0 : index
    %32 = vector.load %arg4[%c0_11, %c0_12] : memref<64x32xf32, #tpu.memory_space<vmem>>, vector<64x32xf32>
    tpu.vector_store %arg4[%c0_11, %c0_12], %31 {strides = array<i32>} : memref<64x32xf32, #tpu.memory_space<vmem>>, vector<64x32xf32>,
    return
  }
  func.func @transform_0(%arg0: i32) -> (i32, i32) {
    %c0_i32 = arith.constant 0 : i32
    %c0_i32_0 = arith.constant 0 : i32
    return %arg0, %c0_i32 : i32, i32
  }
  func.func @transform_1(%arg0: i32) -> (i32, i32) {
    %c0_i32 = arith.constant 0 : i32
    %c0_i32_0 = arith.constant 0 : i32
    %c0_i32_1 = arith.constant 0 : i32
    return %c0_i32, %c0_i32_0 : i32, i32
  }
  func.func @transform_2(%arg0: i32) -> (i32, i32) {
    %c0_i32 = arith.constant 0 : i32
    %c0_i32_0 = arith.constant 0 : i32
    %c0_i32_1 = arith.constant 0 : i32
    return %c0_i32, %c0_i32_0 : i32, i32
  }
  func.func @transform_3(%arg0: i32) -> (i32, i32) {
    %c0_i32 = arith.constant 0 : i32
    %c0_i32_0 = arith.constant 0 : i32
    return %arg0, %c0_i32 : i32, i32
  }
}

</mosaic_0001>

<bundles_post_ra>
// kernel: tpu_custom_call.1
= control target key start
LH: loop header
LB: loop body
LE: loop exit
PB: predicated region body
PF: predicated region fallthrough
CT: control target
= control target key end

     0   :  { %vm27_vm0 = vcmask 261120   ;;  %v133_v60 = vlaneseq  ;;  %s587_s0 = inlined_call_operand.vmem [shape: f32[64,32], index: 0, kind: input, shape index: {}]   ;;  %s588_s1 = inlined_call_operand.vmem [shape: f32[32,32], index: 1, kind: input, shape index: {}]   ;;  %s589_s2 = inlined_call_operand.vmem [shape: f32[8,32], index: 2, kind: input, shape index: {}]   ;;  %s590_s3 = inlined_call_operand.vmem [shape: f32[64,32], index: 3, kind: output, shape index: {}]  }
   0x1   :  { %v405_v0 = vld [vmem:[%s587_s0] sm:$0xff]  ;;  %v410_v1 = vld [vmem:[%s587_s0 + $0x8] sm:$0xff]  ;;  %v433_v8 = vld [vmem:[%s587_s0 + $0x10] sm:$0xff] }
   0x2   :  { %v415_v2 = vld [vmem:[%s587_s0 + $0x20] sm:$0xff]  ;;  %v28_v3 = vsel %vm27_vm0, %v405_v0, 0.0  ;;  %v31_v4 = vsel %vm27_vm0, %v410_v1, 0.0  ;;  %v424_v5 = vld [vmem:[%s587_s0 + $0x28] sm:$0xff]  ;;  %v438_v9 = vld [vmem:[%s587_s0 + $0x30] sm:$0xff]  ;;  %v34_v10 = vsel %vm27_vm0, %v433_v8, 0.0 }
   0x3   :  { %29 = vadd.xlane.f32.xlu0 %v28_v3  ;;  %32 = vadd.xlane.f32.xlu1 %v31_v4  ;;  %v40_v6 = vsel %vm27_vm0, %v415_v2, 0.0  ;;  %v43_v7 = vsel %vm27_vm0, %v424_v5, 0.0  ;;  %v46_v11 = vsel %vm27_vm0, %v438_v9, 0.0  ;;  %v447_v12 = vld [vmem:[%s587_s0 + $0x18] sm:$0xff]  ;;  %v24_v57 = vld [vmem:[%s588_s1 + $0x10] sm:$0xff]  ;;  %v23_v58 = vld [vmem:[%s588_s1 + $0x8] sm:$0xff] }
   0x4   :  { %v452_v13 = vld [vmem:[%s587_s0 + $0x38] sm:$0xff]  ;;  %v37_v14 = vsel %vm27_vm0, %v447_v12, 0.0  ;;  %v22_v59 = vld [vmem:[%s588_s1] sm:$0xff]  ;;  %v134_v61 = vshrl.u32 %v133_v60, 7 }
   0x5   :  { %v49_v15 = vsel %vm27_vm0, %v452_v13, 0.0  ;;  %v25_v56 = vld [vmem:[%s588_s1 + $0x18] sm:$0xff]  ;;  %v26_v63 = vld [vmem:[%s589_s2] sm:$0xff] }
   0x6   :  { %338 = vmatprep.subr.mxu0 %v25_v56  ;;  %358 = vmatprep.subr.mxu1 %v25_v56  ;;  %v159_v62 = vsub.s32 0, %v134_v61 }
   0x7   :  { %41 = vadd.xlane.f32.xlu0 %v40_v6  ;;  %44 = vadd.xlane.f32.xlu1 %v43_v7 }
   0x8   :  { %339 = vmatpush3.msra.mxu0 %v25_v56  ;;  %362 = vmatpush3.msra.mxu1 %v25_v56  ;;  %v521_v3 = vrot.slane %v26_v63, %v159_v62 }
   0x9   :  { %340 = vmatprep.subr.mxu0 %v24_v57  ;;  %359 = vmatprep.subr.mxu1 %v24_v57 }
   0xa   :  { %341 = vmatpush3.msra.mxu0 %v24_v57  ;;  %363 = vmatpush3.msra.mxu1 %v24_v57 }
   0xb   :  { %35 = vadd.xlane.f32.xlu0 %v34_v10  ;;  %47 = vadd.xlane.f32.xlu1 %v46_v11 }
   0xc   :  { %342 = vmatprep.subr.mxu0 %v23_v58  ;;  %360 = vmatprep.subr.mxu1 %v23_v58 }
   0xd   :  { %343 = vmatpush3.msra.mxu0 %v23_v58  ;;  %364 = vmatpush3.msra.mxu1 %v23_v58 }
   0xe   :  { %344 = vmatprep.subr.mxu0 %v22_v59  ;;  %361 = vmatprep.subr.mxu1 %v22_v59 }
   0xf   :  { %38 = vadd.xlane.f32.xlu0 %v37_v14  ;;  %50 = vadd.xlane.f32.xlu1 %v49_v15 }
  0x10   :  { %345 = vmatpush3.msra.mxu0 %v22_v59  ;;  %365 = vmatpush3.msra.mxu1 %v22_v59 }
  0x8c   :  { %v30_v16 = vpop.xlane.xlu0 %29  ;;  %v33_v17 = vpop.xlane.xlu1 %32 }
  0x8d   :  { %v53_v18 = vmul.f32 0.03125, %v30_v16  ;;  %v54_v19 = vmul.f32 0.03125, %v33_v17 }
  0x8f   :  { %v459_v20 = vsub.f32 %v405_v0, %v53_v18  ;;  %v462_v21 = vsub.f32 %v410_v1, %v54_v19 }
  0x90   :  { %v42_v22 = vpop.xlane.xlu0 %41  ;;  %v45_v23 = vpop.xlane.xlu1 %44 }
  0x91   :  { %v57_v24 = vmul.f32 0.03125, %v42_v22  ;;  %v58_v25 = vmul.f32 0.03125, %v45_v23  ;;  %v69_v26 = vmul.f32 %v459_v20, %v459_v20  ;;  %v70_v27 = vmul.f32 %v462_v21, %v462_v21 }
  0x93   :  { %v469_v28 = vsub.f32 %v415_v2, %v57_v24  ;;  %v472_v29 = vsub.f32 %v424_v5, %v58_v25  ;;  %v77_v30 = vsel %vm27_vm0, %v69_v26, 0.0  ;;  %v80_v33 = vsel %vm27_vm0, %v70_v27, 0.0 }
  0x94   :  { %78 = vadd.xlane.f32.xlu0 %v77_v30  ;;  %v36_v31 = vpop.xlane.xlu0 %35  ;;  %v48_v32 = vpop.xlane.xlu1 %47 }
  0x95   :  { %v55_v34 = vmul.f32 0.03125, %v36_v31  ;;  %v59_v35 = vmul.f32 0.03125, %v48_v32  ;;  %v73_v36 = vmul.f32 %v469_v28, %v469_v28  ;;  %v74_v37 = vmul.f32 %v472_v29, %v472_v29 }
  0x96   :  { %v135_v32 = vsub.s32 1, %v134_v61 }
  0x97   :  { %v481_v38 = vsub.f32 %v433_v8, %v55_v34  ;;  %v484_v39 = vsub.f32 %v438_v9, %v59_v35  ;;  %v89_v40 = vsel %vm27_vm0, %v73_v36, 0.0  ;;  %v92_v43 = vsel %vm27_vm0, %v74_v37, 0.0 }
  0x98   :  { %81 = vadd.xlane.f32.xlu0 %v80_v33  ;;  %90 = vadd.xlane.f32.xlu1 %v89_v40  ;;  %v39_v41 = vpop.xlane.xlu0 %38  ;;  %v51_v42 = vpop.xlane.xlu1 %50  ;;  %v147_v35 = vsub.s32 2, %v134_v61  ;;  %v136_v40 = vrot.slane %v26_v63, %v135_v32 }
  0x99   :  { %v56_v44 = vmul.f32 0.03125, %v39_v41  ;;  %v60_v45 = vmul.f32 0.03125, %v51_v42  ;;  %v71_v46 = vmul.f32 %v481_v38, %v481_v38  ;;  %v75_v47 = vmul.f32 %v484_v39, %v484_v39 }
  0x9b   :  { %v493_v48 = vsub.f32 %v447_v12, %v56_v44  ;;  %v496_v49 = vsub.f32 %v452_v13, %v60_v45  ;;  %v83_v50 = vsel %vm27_vm0, %v71_v46, 0.0  ;;  %v95_v51 = vsel %vm27_vm0, %v75_v47, 0.0 }
  0x9c   :  { %93 = vadd.xlane.f32.xlu1 %v92_v43  ;;  %84 = vadd.xlane.f32.xlu0 %v83_v50  ;;  %v148_v44 = vrot.slane %v26_v63, %v147_v35 }
  0x9d   :  { %v72_v52 = vmul.f32 %v493_v48, %v493_v48  ;;  %v76_v53 = vmul.f32 %v496_v49, %v496_v49 }
  0x9f   :  { %v86_v54 = vsel %vm27_vm0, %v72_v52, 0.0  ;;  %v98_v55 = vsel %vm27_vm0, %v76_v53, 0.0 }
  0xa0   :  { %96 = vadd.xlane.f32.xlu1 %v95_v51  ;;  %87 = vadd.xlane.f32.xlu0 %v86_v54 }
  0xa4   :  { %99 = vadd.xlane.f32.xlu1 %v98_v55 }
 0x11d   :  { %v79_v4 = vpop.xlane.xlu0 %78 }
 0x11e   :  { %v101_v6 = vmul.f32 0.03125, %v79_v4 }
 0x120   :  { %v109_v7 = vadd.f32 1e-05, %v101_v6 }
 0x121   :  { %v91_v10 = vpop.xlane.xlu1 %90  ;;  %v82_v11 = vpop.xlane.xlu0 %81 }
 0x122   :  { %366 = vrsqrt.f32 %v109_v7  ;;  %v105_v14 = vmul.f32 0.03125, %v91_v10  ;;  %v102_v15 = vmul.f32 0.03125, %v82_v11 }
 0x124   :  { %v113_v16 = vadd.f32 1e-05, %v105_v14  ;;  %v110_v17 = vadd.f32 1e-05, %v102_v15 }
 0x125   :  { %v94_v18 = vpop.xlane.xlu1 %93  ;;  %v85_v19 = vpop.xlane.xlu0 %84 }
 0x126   :  { %368 = vrsqrt.f32 %v113_v16  ;;  %v106_v22 = vmul.f32 0.03125, %v94_v18  ;;  %v103_v23 = vmul.f32 0.03125, %v85_v19 }
 0x127   :  { %370 = vrsqrt.f32 %v110_v17 }
 0x128   :  { %v114_v24 = vadd.f32 1e-05, %v106_v22  ;;  %v111_v25 = vadd.f32 1e-05, %v103_v23 }
 0x129   :  { %v97_v26 = vpop.xlane.xlu1 %96  ;;  %v88_v27 = vpop.xlane.xlu0 %87 }
 0x12a   :  { %372 = vrsqrt.f32 %v114_v24  ;;  %v107_v30 = vmul.f32 0.03125, %v97_v26  ;;  %v104_v31 = vmul.f32 0.03125, %v88_v27 }
 0x12b   :  { %374 = vrsqrt.f32 %v111_v25 }
 0x12c   :  { %v115_v33 = vadd.f32 1e-05, %v107_v30  ;;  %v112_v34 = vadd.f32 1e-05, %v104_v31 }
 0x12d   :  { %v100_v36 = vpop.xlane.xlu1 %99 }
 0x12e   :  { %376 = vrsqrt.f32 %v115_v33  ;;  %v108_v37 = vmul.f32 0.03125, %v100_v36 }
 0x12f   :  { %v367_v41 = vpop.eup %366  ;;  %378 = vrsqrt.f32 %v112_v34 }
 0x130   :  { %v116_v42 = vadd.f32 1e-05, %v108_v37  ;;  %v125_v43 = vmul.f32 %v367_v41, %v459_v20 }
 0x132   :  { %380 = vrsqrt.f32 %v116_v42  ;;  %v137_v45 = vmul.f32 %v136_v40, %v125_v43 }
 0x133   :  { %v369_v46 = vpop.eup %368 }
 0x134   :  { %v371_v47 = vpop.eup %370  ;;  %v149_v50 = vadd.f32 %v148_v44, %v137_v45  ;;  %v129_v51 = vmul.f32 %v369_v46, %v469_v28 }
 0x135   :  { %v126_v52 = vmul.f32 %v371_v47, %v462_v21 }
 0x136   :  { %346 = vmatprep.mubr.msk.f32.mxu0 %vm27_vm0, %v149_v50  ;;  %v141_v53 = vmul.f32 %v136_v40, %v129_v51 }
 0x137   :  { %v373_v54 = vpop.eup %372  ;;  %v138_v55 = vmul.f32 %v136_v40, %v126_v52 }
 0x138   :  { %v375_v56 = vpop.eup %374  ;;  %v153_v57 = vadd.f32 %v148_v44, %v141_v53  ;;  %v130_v58 = vmul.f32 %v373_v54, %v472_v29 }
 0x139   :  { %v150_v20 = vadd.f32 %v148_v44, %v138_v55  ;;  %v127_v59 = vmul.f32 %v375_v56, %v481_v38 }
 0x13a   :  { %352 = vmatprep.mubr.msk.f32.mxu1 %vm27_vm0, %v153_v57  ;;  %v142_v60 = vmul.f32 %v136_v40, %v130_v58 }
 0x13b   :  { %v377_v61 = vpop.eup %376  ;;  %347 = vmatmul.mubr.msk.f32.vlgmr.msra.gmra.mxu0 %vm27_vm0, %v150_v20  ;;  %v139_v28 = vmul.f32 %v136_v40, %v127_v59 }
 0x13c   :  { %v379_v21 = vpop.eup %378  ;;  %v154_v62 = vadd.f32 %v148_v44, %v142_v60  ;;  %v131_v63 = vmul.f32 %v377_v61, %v484_v39 }
 0x13d   :  { %v151_v4 = vadd.f32 %v148_v44, %v139_v28  ;;  %v128_v6 = vmul.f32 %v379_v21, %v493_v48 }
 0x13e   :  { %353 = vmatmul.mubr.msk.f32.vlgmr.msra.gmra.mxu1 %vm27_vm0, %v154_v62  ;;  %v143_v29 = vmul.f32 %v136_v40, %v131_v63 }
 0x13f   :  { %v381_v7 = vpop.eup %380  ;;  %349 = vmatprep.mubr.msk.f32.mxu0 %vm27_vm0, %v151_v4  ;;  %v140_v38 = vmul.f32 %v136_v40, %v128_v6 }
 0x140   :  { %v155_v10 = vadd.f32 %v148_v44, %v143_v29  ;;  %v132_v11 = vmul.f32 %v381_v7, %v496_v49 }
 0x141   :  { %v152_v14 = vadd.f32 %v148_v44, %v140_v38 }
 0x142   :  { %355 = vmatprep.mubr.msk.f32.mxu1 %vm27_vm0, %v155_v10  ;;  %v144_v15 = vmul.f32 %v136_v40, %v132_v11 }
 0x143   :  { %350 = vmatmul.mubr.msk.f32.gmra.mxu0 %vm27_vm0, %v152_v14 }
 0x144   :  { %v156_v39 = vadd.f32 %v148_v44, %v144_v15 }
 0x146   :  { %356 = vmatmul.mubr.msk.f32.gmra.mxu1 %vm27_vm0, %v156_v39 }
 0x1fb   :  { %v348_v48 = vpop.f32.mrf.mxu0 }
 0x1fc   :  { %v257_v16 = vadd.f32 %v348_v48, %v521_v3 }
 0x1fd   :  { %v251_v17 = vpop.f32.mrf.mxu0 }
 0x1fe   :  { %v291_v18 = vmax.f32 %v257_v16, 0.0  ;;  %v252_v19 = vadd.f32 %v251_v17, %v521_v3  ;;  %v354_v22 = vpop.f32.mrf.mxu1 }
 0x1ff   :  { %v277_v23 = vadd.f32 %v354_v22, %v521_v3 }
 0x200   :  { %v299_v49 = vadd.f32 %v291_v18, %v410_v1  ;;  %v290_v24 = vmax.f32 %v252_v19, 0.0  ;;  %v271_v25 = vpop.f32.mrf.mxu1 }
 0x201   :  { %v295_v26 = vmax.f32 %v277_v23, 0.0  ;;  %v272_v27 = vadd.f32 %v271_v25, %v521_v3 }
 0x202   :  { %307 = vst.msk [vmem:[%s590_s3 + $0x8] sm:$0xff] %vm27_vm0, %v299_v49  ;;  %v298_v30 = vadd.f32 %v290_v24, %v405_v0 }
 0x203   :  { %v303_v31 = vadd.f32 %v295_v26, %v424_v5  ;;  %v294_v32 = vmax.f32 %v272_v27, 0.0  ;;  %v351_v33 = vpop.f32.mrf.mxu0 }
 0x204   :  { %306 = vst.msk [vmem:[%s590_s3] sm:$0xff] %vm27_vm0, %v298_v30  ;;  %v267_v1 = vadd.f32 %v351_v33, %v521_v3 }
 0x205   :  { %311 = vst.msk [vmem:[%s590_s3 + $0x28] sm:$0xff] %vm27_vm0, %v303_v31  ;;  %v302_v34 = vadd.f32 %v294_v32, %v415_v2  ;;  %v261_v35 = vpop.f32.mrf.mxu0 }
 0x206   :  { %v293_v0 = vmax.f32 %v267_v1, 0.0  ;;  %v262_v5 = vadd.f32 %v261_v35, %v521_v3  ;;  %v357_v36 = vpop.f32.mrf.mxu1 }
 0x207   :  { %310 = vst.msk [vmem:[%s590_s3 + $0x20] sm:$0xff] %vm27_vm0, %v302_v34  ;;  %v287_v37 = vadd.f32 %v357_v36, %v521_v3 }
 0x208   :  { %v301_v40 = vadd.f32 %v293_v0, %v447_v12  ;;  %v292_v41 = vmax.f32 %v262_v5, 0.0  ;;  %v281_v42 = vpop.f32.mrf.mxu1 }
 0x209   :  { %v297_v43 = vmax.f32 %v287_v37, 0.0  ;;  %v282_v44 = vadd.f32 %v281_v42, %v521_v3 }
 0x20a   :  { %309 = vst.msk [vmem:[%s590_s3 + $0x18] sm:$0xff] %vm27_vm0, %v301_v40  ;;  %v300_v2 = vadd.f32 %v292_v41, %v433_v8 }
 0x20b   :  { %v305_v45 = vadd.f32 %v297_v43, %v452_v13  ;;  %v296_v46 = vmax.f32 %v282_v44, 0.0 }
 0x20c   :  { %308 = vst.msk [vmem:[%s590_s3 + $0x10] sm:$0xff] %vm27_vm0, %v300_v2 }
 0x20d   :  { %313 = vst.msk [vmem:[%s590_s3 + $0x38] sm:$0xff] %vm27_vm0, %v305_v45  ;;  %v304_v12 = vadd.f32 %v296_v46, %v438_v9 }
 0x20f   :  { %312 = vst.msk [vmem:[%s590_s3 + $0x30] sm:$0xff] %vm27_vm0, %v304_v12 }

</bundles_post_ra>
